<compile_context>
chip_gen: v5e
topology: v5e:2x2
jax: 0.10.0
libtpu: 0.0.40
codegen_flags: <defaults>
</compile_context>

<pallas_src>
import numpy as np

import jax
import jax.numpy as jnp
from jax.experimental import pallas as pl
from jax.experimental.pallas import tpu as pltpu

# ---- packed parameter block layouts (built once at model-load time) --------
LANES = 384                                  # per-pixel lane slab (288 used, 128-aligned)
# spread block: (SP_ROWS, 4*LANES) float32
SP_WS, SP_BS, SP_PV, SP_B1, SP_B2, SP_ROWS = 0, 12, 13, 14, 15, 16
# dense block: (DW_ROWS, 128) bfloat16
DW_W1, DW_W2, DW_ROWS = 0, 384, 512


def prepare_params(wc_pt, bc, w1_pt, b1, w2_pt, b2):
    """One-time repack of PyTorch weights into two dense parameter blocks.

    spread (f32, (16, 1536)):
      rows 0..11 : spread 1x1-conv weights, row = c*4 + (h*2+w); the columns of
                   pixel p live in its slab [p*384, p*384+288) laid out as
                   q*32 + out_ch (q = pool-window index).
      row 12     : spread conv bias (same slab layout).
      row 13     : relu(conv bias) of padded border pixels, lanes [0, 288).
      rows 14,15 : fc1 / fc2 biases (f32, lanes [0,128) / [0,10)).
    dense (bf16, (512, 128)):
      rows 0..287  : fc1 weight permuted CHW-flat -> window-major, K-padded to 384.
      rows 384..511: fc2 weight, output lanes 10.. zero-padded.
    """
    wc = np.asarray(wc_pt, np.float32).reshape(32, 3)      # [out_ch, in_ch]
    bc = np.asarray(bc, np.float32)                        # (32,)
    w1 = np.asarray(w1_pt, np.float32)                     # (128, 288) CHW flatten
    b1 = np.asarray(b1, np.float32)                        # (128,)
    w2 = np.asarray(w2_pt, np.float32)                     # (10, 128)
    b2 = np.asarray(b2, np.float32)                        # (10,)

    # Participation mask: real pixel p=(h,w) sits at padded position (h+1, w+1)
    # and lies inside pool window q=a*3+b iff a <= h+1 <= a+1 and b <= w+1 <= b+1.
    part = np.zeros((4, 9), np.float32)
    for h in range(2):
        for w in range(2):
            for a in range(3):
                for b in range(3):
                    if a <= h + 1 <= a + 1 and b <= w + 1 <= b + 1:
                        part[h * 2 + w, a * 3 + b] = 1.0

    spread = np.zeros((SP_ROWS, 4 * LANES), np.float32)
    for p in range(4):
        lo = p * LANES
        for c in range(3):                                 # NCHW-flat row order
            spread[SP_WS + c * 4 + p, lo:lo + 288] = (
                part[p][:, None] * wc[:, c][None, :]).reshape(288)
        spread[SP_BS, lo:lo + 288] = (part[p][:, None] * bc[None, :]).reshape(288)
    # Padded border pixels contribute relu(bias); center window q=4 has none.
    pv = np.tile(np.maximum(bc, 0.0)[None, :], (9, 1))
    pv[4] = 0.0
    spread[SP_PV, :288] = pv.reshape(288)
    spread[SP_B1, :128] = b1
    spread[SP_B2, :10] = b2

    dense = np.zeros((DW_ROWS, 128), np.float32)
    # fc1 weight: CHW flatten (c*9 + q) -> window-major (q*32 + c); K-pad to 384.
    dense[DW_W1:DW_W1 + 288] = (w1.T.reshape(32, 3, 3, 128)
                                .transpose(1, 2, 0, 3).reshape(288, 128))
    dense[DW_W2:DW_W2 + 128, :10] = w2.T                   # output lanes 10.. stay 0
    return jnp.asarray(spread), jnp.asarray(dense, dtype=jnp.bfloat16)


def mynet3_kernel(x_ref, s_ref, w_ref, o_ref):
    # x_ref: (TN, 12)        NCHW-flattened inputs (index c*4 + h*2 + w), f32
    # s_ref: (16, 1536)      f32 spread conv weights/bias, padded-pixel row, fc biases
    # w_ref: (512, 128)      bf16 fc1 (384x128, K zero-padded) and fc2 (128x128 lane-padded)
    # o_ref: (TN, 10)        logits
    x = x_ref[...]                                             # (TN, 12)

    # Conv2d(3->32, k=1, pad=1) + ReLU + MaxPool2d(2, stride=1), fused:
    # one small MXU dot per real pixel into its 384-lane window-major slab,
    # then ReLU and element-wise max over the 4 slabs and the padded-pixel row.
    # (All ReLU outputs are >= 0, so zeros in non-participating windows are
    #  neutral under max.)
    flat = s_ref[SP_PV:SP_PV + 1, :LANES]                      # (1, 384) relu(bias) row
    for p in range(4):
        lo = p * LANES
        v = jnp.dot(x, s_ref[SP_WS:SP_WS + 12, lo:lo + LANES],
                    preferred_element_type=jnp.float32)        # (TN, 384)
        v = jnp.maximum(v + s_ref[SP_BS:SP_BS + 1, lo:lo + LANES], 0.0)
        flat = jnp.maximum(flat, v)                            # (TN, 384); lanes 288.. stay 0

    # fc1 + ReLU: (TN,384) @ (384,128), bf16 operands, f32 accumulate.
    h1 = jnp.dot(flat.astype(w_ref.dtype), w_ref[DW_W1:DW_W1 + 384, :],
                 preferred_element_type=jnp.float32)
    h1 = jnp.maximum(h1 + s_ref[SP_B1:SP_B1 + 1, :128], 0.0)   # (TN, 128)

    # fc2: 128-wide dot (weight lanes 10.. are zero); store only the 10 logits.
    out = jnp.dot(h1.astype(w_ref.dtype), w_ref[DW_W2:DW_W2 + 128, :],
                  preferred_element_type=jnp.float32)
    out = out + s_ref[SP_B2:SP_B2 + 1, :128]
    o_ref[...] = out[:, :10]


def _default_batch_tile(n):
    if n <= 8 or n % 8 != 0:
        return n                      # single full-array tile (always legal)
    # >= 2 grid steps whenever n >= 16 (v7x has 2 TensorCores); cap tile at 1024.
    bt = min(1024, max(8, (n // 2) // 8 * 8))
    while n % bt:                     # keep divisibility (multiples of 8 only)
        bt -= 8
    return bt


def mynet3_pallas(x, spread, dense, *, batch_tile=None):
    """x: (N, 3, 2, 2) NCHW float32. spread/dense from prepare_params(). Returns (N, 10)."""
    n = x.shape[0]
    assert x.shape[1:] == (3, 2, 2), "mynet3_1 requires (N, 3, 2, 2) inputs"
    if batch_tile is None:
        batch_tile = _default_batch_tile(n)
    batch_tile = min(batch_tile, n)
    if n % batch_tile != 0:
        raise ValueError("batch must be divisible by batch_tile")
    if batch_tile != n and batch_tile % 8 != 0:
        raise ValueError("batch_tile must be a multiple of 8 when tiling the batch")

    # Free, contiguous NCHW flatten -- no per-forward transpose kernel.
    xf = x.reshape(n, 12)

    grid = (n // batch_tile,)
    out = pl.pallas_call(
        mynet3_kernel,
        out_shape=jax.ShapeDtypeStruct((n, 10), jnp.float32),
        grid_spec=pltpu.PrefetchScalarGridSpec(
            num_scalar_prefetch=0,
            grid=grid,
            in_specs=[
                pl.BlockSpec((batch_tile, 12), lambda b: (b, 0)),
                pl.BlockSpec((SP_ROWS, 4 * LANES), lambda b: (0, 0)),
                pl.BlockSpec((DW_ROWS, 128), lambda b: (0, 0)),
            ],
            out_specs=pl.BlockSpec((batch_tile, 10), lambda b: (b, 0)),
        ),
        compiler_params=pltpu.CompilerParams(
            dimension_semantics=("parallel",)),
    )(xf, spread, dense)
    return out


def mynet3_ref(x, wc_pt, bc, w1_pt, b1, w2_pt, b2):
    """Pure-JAX reference mirroring the PyTorch forward exactly (NCHW, f32)."""
    n = x.shape[0]
    x_pad = jnp.pad(x, ((0, 0), (0, 0), (1, 1), (1, 1)))          # (N, 3, 4, 4)
    conv = jnp.einsum("oc,nchw->nohw", wc_pt.reshape(32, 3), x_pad)
    conv = jax.nn.relu(conv + bc[None, :, None, None])            # (N, 32, 4, 4)
    pooled = jnp.maximum(
        jnp.maximum(conv[:, :, 0:3, 0:3], conv[:, :, 0:3, 1:4]),
        jnp.maximum(conv[:, :, 1:4, 0:3], conv[:, :, 1:4, 1:4]),
    )                                                             # (N, 32, 3, 3)
    flat = pooled.reshape(n, 32 * 3 * 3)                          # CHW flatten
    h1 = jax.nn.relu(flat @ w1_pt.T + b1)
    return h1 @ w2_pt.T + b2


if __name__ == "__main__":
    key = jax.random.PRNGKey(0)
    ks = jax.random.split(key, 8)

    # Deterministic synthetic parameters (PyTorch shapes).
    wc_pt = jax.random.normal(ks[0], (32, 3, 1, 1), jnp.float32) * 0.2   # Conv2d weight
    bc    = jax.random.normal(ks[1], (32,), jnp.float32) * 0.1           # Conv2d bias
    w1_pt = jax.random.normal(ks[2], (128, 288), jnp.float32) * 0.05     # Linear(288,128)
    b1    = jax.random.normal(ks[3], (128,), jnp.float32) * 0.05
    w2_pt = jax.random.normal(ks[4], (10, 128), jnp.float32) * 0.05      # Linear(128,10)
    b2    = jax.random.normal(ks[5], (10,), jnp.float32) * 0.05

    # One-time weight repacking (model-load time, not per forward).
    spread, dense = prepare_params(wc_pt, bc, w1_pt, b1, w2_pt, b2)

    # Looser tolerance because fc1/fc2 weights are stored in bf16 (f32 accumulate).
    ATOL = RTOL = 2e-2

    # Toy batch N=2 (only spatial size compatible with Linear(32*3*3, ...)).
    x = jax.random.normal(ks[6], (2, 3, 2, 2), jnp.float32)
    out = jax.block_until_ready(mynet3_pallas(x, spread, dense))
    ref = mynet3_ref(x, wc_pt, bc, w1_pt, b1, w2_pt, b2)
    assert out.shape == (2, 10)
    assert jnp.allclose(out, ref, atol=ATOL, rtol=RTOL), "Pallas output != reference (N=2)"

    # Larger batch exercising the batch grid (default tile -> 2 tiles of 8,
    # 'parallel' semantics so v7x can use both TensorCores).
    x16 = jax.random.normal(ks[7], (16, 3, 2, 2), jnp.float32)
    out16 = jax.block_until_ready(mynet3_pallas(x16, spread, dense))
    ref16 = mynet3_ref(x16, wc_pt, bc, w1_pt, b1, w2_pt, b2)
    assert out16.shape == (16, 10)
    assert jnp.allclose(out16, ref16, atol=ATOL, rtol=RTOL), "Pallas output != reference (N=16)"

    print("KERNEL_OK")
</pallas_src>

<mosaic_0001>
module attributes {stable_mosaic.version = 11 : i64} {
  func.func @mynet3_kernel(%arg0: i32, %arg1: memref<2x12xf32, #tpu.memory_space<vmem>>, %arg2: memref<16x1536xf32, #tpu.memory_space<vmem>>, %arg3: memref<512x128xbf16, #tpu.memory_space<vmem>>, %arg4: memref<2x10xf32, #tpu.memory_space<vmem>>) attributes {dimension_semantics = [#tpu.dimension_semantics<parallel>], iteration_bounds = array<i64: 1>, scalar_prefetch = 0 : i64, scratch_operands = 0 : i64, tpu.core_type = #tpu.core_type<tc>, window_params = [{transform_indices = @transform_0, window_bounds = array<i64: 2, 12>}, {pipeline_mode = #tpu.pipeline_mode<synchronous>, transform_indices = @transform_1, window_bounds = array<i64: 16, 1536>}, {pipeline_mode = #tpu.pipeline_mode<synchronous>, transform_indices = @transform_2, window_bounds = array<i64: 512, 128>}, {transform_indices = @transform_3, window_bounds = array<i64: 2, 10>}]} {
    %c0 = arith.constant 0 : index
    %c0_0 = arith.constant 0 : index
    %0 = vector.load %arg1[%c0, %c0_0] : memref<2x12xf32, #tpu.memory_space<vmem>>, vector<2x12xf32>
    %c13 = arith.constant 13 : index
    %c0_1 = arith.constant 0 : index
    %1 = vector.load %arg2[%c13, %c0_1] : memref<16x1536xf32, #tpu.memory_space<vmem>>, vector<1x384xf32>
    %c0_2 = arith.constant 0 : index
    %c0_3 = arith.constant 0 : index
    %2 = vector.load %arg2[%c0_2, %c0_3] : memref<16x1536xf32, #tpu.memory_space<vmem>>, vector<12x384xf32>
    %cst = arith.constant dense<0.000000e+00> : vector<2x384xf32>
    %3 = tpu.matmul %0, %2, %cst {dimension_numbers = #tpu.dot_dimension_numbers<[1], [0], [0], [1], [0, 0, 1, 1], [], []>} : vector<2x12xf32>, vector<12x384xf32>, vector<2x384xf32> -> vector<2x384xf32>
    %c12 = arith.constant 12 : index
    %c0_4 = arith.constant 0 : index
    %4 = vector.load %arg2[%c12, %c0_4] : memref<16x1536xf32, #tpu.memory_space<vmem>>, vector<1x384xf32>
    %5 = vector.broadcast %4 : vector<1x384xf32> to vector<2x384xf32>
    %6 = arith.addf %3, %5 : vector<2x384xf32>
    %cst_5 = arith.constant 0.000000e+00 : f32
    %7 = vector.broadcast %cst_5 : f32 to vector<2x384xf32>
    %8 = arith.maximumf %6, %7 : vector<2x384xf32>
    %9 = vector.broadcast %1 : vector<1x384xf32> to vector<2x384xf32>
    %10 = arith.maximumf %9, %8 : vector<2x384xf32>
    %c0_6 = arith.constant 0 : index
    %c384 = arith.constant 384 : index
    %11 = vector.load %arg2[%c0_6, %c384] : memref<16x1536xf32, #tpu.memory_space<vmem>>, vector<12x384xf32>
    %cst_7 = arith.constant dense<0.000000e+00> : vector<2x384xf32>
    %12 = tpu.matmul %0, %11, %cst_7 {dimension_numbers = #tpu.dot_dimension_numbers<[1], [0], [0], [1], [0, 0, 1, 1], [], []>} : vector<2x12xf32>, vector<12x384xf32>, vector<2x384xf32> -> vector<2x384xf32>
    %c12_8 = arith.constant 12 : index
    %c384_9 = arith.constant 384 : index
    %13 = vector.load %arg2[%c12_8, %c384_9] : memref<16x1536xf32, #tpu.memory_space<vmem>>, vector<1x384xf32>
    %14 = vector.broadcast %13 : vector<1x384xf32> to vector<2x384xf32>
    %15 = arith.addf %12, %14 : vector<2x384xf32>
    %cst_10 = arith.constant 0.000000e+00 : f32
    %16 = vector.broadcast %cst_10 : f32 to vector<2x384xf32>
    %17 = arith.maximumf %15, %16 : vector<2x384xf32>
    %18 = arith.maximumf %10, %17 : vector<2x384xf32>
    %c0_11 = arith.constant 0 : index
    %c768 = arith.constant 768 : index
    %19 = vector.load %arg2[%c0_11, %c768] : memref<16x1536xf32, #tpu.memory_space<vmem>>, vector<12x384xf32>
    %cst_12 = arith.constant dense<0.000000e+00> : vector<2x384xf32>
    %20 = tpu.matmul %0, %19, %cst_12 {dimension_numbers = #tpu.dot_dimension_numbers<[1], [0], [0], [1], [0, 0, 1, 1], [], []>} : vector<2x12xf32>, vector<12x384xf32>, vector<2x384xf32> -> vector<2x384xf32>
    %c12_13 = arith.constant 12 : index
    %c768_14 = arith.constant 768 : index
    %21 = vector.load %arg2[%c12_13, %c768_14] : memref<16x1536xf32, #tpu.memory_space<vmem>>, vector<1x384xf32>
    %22 = vector.broadcast %21 : vector<1x384xf32> to vector<2x384xf32>
    %23 = arith.addf %20, %22 : vector<2x384xf32>
    %cst_15 = arith.constant 0.000000e+00 : f32
    %24 = vector.broadcast %cst_15 : f32 to vector<2x384xf32>
    %25 = arith.maximumf %23, %24 : vector<2x384xf32>
    %26 = arith.maximumf %18, %25 : vector<2x384xf32>
    %c0_16 = arith.constant 0 : index
    %c1152 = arith.constant 1152 : index
    %27 = vector.load %arg2[%c0_16, %c1152] : memref<16x1536xf32, #tpu.memory_space<vmem>>, vector<12x384xf32>
    %cst_17 = arith.constant dense<0.000000e+00> : vector<2x384xf32>
    %28 = tpu.matmul %0, %27, %cst_17 {dimension_numbers = #tpu.dot_dimension_numbers<[1], [0], [0], [1], [0, 0, 1, 1], [], []>} : vector<2x12xf32>, vector<12x384xf32>, vector<2x384xf32> -> vector<2x384xf32>
    %c12_18 = arith.constant 12 : index
    %c1152_19 = arith.constant 1152 : index
    %29 = vector.load %arg2[%c12_18, %c1152_19] : memref<16x1536xf32, #tpu.memory_space<vmem>>, vector<1x384xf32>
    %30 = vector.broadcast %29 : vector<1x384xf32> to vector<2x384xf32>
    %31 = arith.addf %28, %30 : vector<2x384xf32>
    %cst_20 = arith.constant 0.000000e+00 : f32
    %32 = vector.broadcast %cst_20 : f32 to vector<2x384xf32>
    %33 = arith.maximumf %31, %32 : vector<2x384xf32>
    %34 = arith.maximumf %26, %33 : vector<2x384xf32>
    %35 = arith.truncf %34 : vector<2x384xf32> to vector<2x384xbf16>
    %c0_21 = arith.constant 0 : index
    %c0_22 = arith.constant 0 : index
    %36 = vector.load %arg3[%c0_21, %c0_22] : memref<512x128xbf16, #tpu.memory_space<vmem>>, vector<384x128xbf16>
    %cst_23 = arith.constant dense<0.000000e+00> : vector<2x128xf32>
    %37 = tpu.matmul %35, %36, %cst_23 {dimension_numbers = #tpu.dot_dimension_numbers<[1], [0], [0], [1], [0, 0, 1, 1], [], []>} : vector<2x384xbf16>, vector<384x128xbf16>, vector<2x128xf32> -> vector<2x128xf32>
    %c14 = arith.constant 14 : index
    %c0_24 = arith.constant 0 : index
    %38 = vector.load %arg2[%c14, %c0_24] : memref<16x1536xf32, #tpu.memory_space<vmem>>, vector<1x128xf32>
    %39 = vector.broadcast %38 : vector<1x128xf32> to vector<2x128xf32>
    %40 = arith.addf %37, %39 : vector<2x128xf32>
    %cst_25 = arith.constant 0.000000e+00 : f32
    %41 = vector.broadcast %cst_25 : f32 to vector<2x128xf32>
    %42 = arith.maximumf %40, %41 : vector<2x128xf32>
    %43 = arith.truncf %42 : vector<2x128xf32> to vector<2x128xbf16>
    %c384_26 = arith.constant 384 : index
    %c0_27 = arith.constant 0 : index
    %44 = vector.load %arg3[%c384_26, %c0_27] : memref<512x128xbf16, #tpu.memory_space<vmem>>, vector<128x128xbf16>
    %cst_28 = arith.constant dense<0.000000e+00> : vector<2x128xf32>
    %45 = tpu.matmul %43, %44, %cst_28 {dimension_numbers = #tpu.dot_dimension_numbers<[1], [0], [0], [1], [0, 0, 1, 1], [], []>} : vector<2x128xbf16>, vector<128x128xbf16>, vector<2x128xf32> -> vector<2x128xf32>
    %c15 = arith.constant 15 : index
    %c0_29 = arith.constant 0 : index
    %46 = vector.load %arg2[%c15, %c0_29] : memref<16x1536xf32, #tpu.memory_space<vmem>>, vector<1x128xf32>
    %47 = vector.broadcast %46 : vector<1x128xf32> to vector<2x128xf32>
    %48 = arith.addf %45, %47 : vector<2x128xf32>
    %49 = vector.extract_strided_slice %48 {offsets = [0, 0], sizes = [2, 10], strides = [1, 1]} : vector<2x128xf32> to vector<2x10xf32>
    %c0_30 = arith.constant 0 : index
    %c0_31 = arith.constant 0 : index
    %50 = vector.load %arg4[%c0_30, %c0_31] : memref<2x10xf32, #tpu.memory_space<vmem>>, vector<2x10xf32>
    tpu.vector_store %arg4[%c0_30, %c0_31], %49 {strides = array<i32>} : memref<2x10xf32, #tpu.memory_space<vmem>>, vector<2x10xf32>,
    return
  }
  func.func @transform_0(%arg0: i32) -> (i32, i32) {
    %c0_i32 = arith.constant 0 : i32
    %c0_i32_0 = arith.constant 0 : i32
    return %arg0, %c0_i32 : i32, i32
  }
  func.func @transform_1(%arg0: i32) -> (i32, i32) {
    %c0_i32 = arith.constant 0 : i32
    %c0_i32_0 = arith.constant 0 : i32
    %c0_i32_1 = arith.constant 0 : i32
    return %c0_i32, %c0_i32_0 : i32, i32
  }
  func.func @transform_2(%arg0: i32) -> (i32, i32) {
    %c0_i32 = arith.constant 0 : i32
    %c0_i32_0 = arith.constant 0 : i32
    %c0_i32_1 = arith.constant 0 : i32
    return %c0_i32, %c0_i32_0 : i32, i32
  }
  func.func @transform_3(%arg0: i32) -> (i32, i32) {
    %c0_i32 = arith.constant 0 : i32
    %c0_i32_0 = arith.constant 0 : i32
    return %arg0, %c0_i32 : i32, i32
  }
}

</mosaic_0001>

<bundles_post_ra>
// kernel: tpu_custom_call.1
= control target key start
LH: loop header
LB: loop body
LE: loop exit
PB: predicated region body
PF: predicated region fallthrough
CT: control target
= control target key end

     0   :  { %8 = vsyncpa [#allocation3], 0  ;;  %s1128_s0 = inlined_call_operand.hbm [shape: f32[2,12], index: 0, kind: input, shape index: {}]   ;;  %s1129_s1 = inlined_call_operand.hbm [shape: f32[16,1536], index: 1, kind: input, shape index: {}]   ;;  %s1130_s2 = inlined_call_operand.hbm [shape: bf16[512,128], index: 2, kind: input, shape index: {}]   ;;  %s1131_s3 = inlined_call_operand.hbm [shape: f32[2,10], index: 3, kind: output, shape index: {}]  }
   0x1   :  { %9 = vsyncpa [#allocation6], 0  ;;  %s26_s14 = sshll.u32 %s1129_s1, 4  ;;  %s27_s14 = int_to_ptr.hbm [resolvable:$true] %s26_s14 }
   0x2   :  { %10 = vsyncpa [#allocation4], 0  ;;  %s1064_s15 = smov [#allocation5]   ;;  %s16_s19 = sshll.u32 %s1128_s0, 4  ;;  %s17_s19 = int_to_ptr.hbm [resolvable:$true] %s16_s19 }
   0x3   :  { %s28_s16 = sshll.u32 %s1064_s15, 4  ;;  %s1065_s20 = smov 1536   ;;  %s29_s16 = int_to_ptr.vmem [resolvable:$true] %s28_s16 }
   0x4   :  { %s1066_s21 = smov 96   ;;  %s1067_s22 = smov [#allocation2]  }
   0x5   :  { %34 = dma.hbm_to_vmem [thread:$0]  %s27_s14, 3072, %s29_s16, [#allocation6], %s1065_s20, %s1065_s20, %s1066_s21  }
   0x6   :  { %s18_s23 = sshll.u32 %s1067_s22, 4  ;;  %s39_s26 = sshll.u32 %s1130_s2, 4  ;;  %s19_s23 = int_to_ptr.vmem [resolvable:$true] %s18_s23  ;;  %s40_s26 = int_to_ptr.hbm [resolvable:$true] %s39_s26 }
   0x7   :  { %21 = dma.hbm_to_vmem [thread:$0]  %s17_s19, 32, %s19_s23, [#allocation3]  }
   0x8   :  { %s1068_s1 = smov [#allocation7]   ;;  %s1069_s28 = smov 64  }
   0x9   :  { %s41_s27 = sshll.u32 %s1068_s1, 4  ;;  %s1070_s29 = smov 4   ;;  %s42_s27 = int_to_ptr.vmem [resolvable:$true] %s41_s27 }
   0xa   :  { %47 = dma.hbm_to_vmem [thread:$0]  %s40_s26, 4096, %s42_s27, [#allocation6], %s1069_s28, %s1069_s28, %s1070_s29  }
   0xb   :  { %1058 = dma.done.wait [#allocation3], 32  }
   0xc   :  { %1059 = vsyncadd [#allocation3], 4294967264 }
   0xd   :  { %1060 = dma.done.wait [#allocation6], 7168  }
   0xe   :  { %1061 = vsyncadd [#allocation6], 4294960128  ;;  %vm82_vm0 = vcmask 1043456   ;;  %v66_v0 = vld [vmem:[#allocation5 + $0x60] sm:$0xf]  ;;  %v64_v5 = vld [vmem:[#allocation5 + $0x8] sm:$0xff] }
   0xf   :  { %v67_v1 = vld [vmem:[#allocation5 + $0x68] sm:$0xf]  ;;  %v68_v2 = vld [vmem:[#allocation5 + $0x70] sm:$0xf]  ;;  %770 = vmatpush.msk.msra.mxu0 %vm82_vm0, %v66_v0  ;;  %v168_v3 = vld [vmem:[#allocation5 + $0x78] sm:$0xf] }
  0x10   :  { %772 = vmatpush.msk.msra.mxu1 %vm82_vm0, %v67_v1  ;;  %v63_v4 = vld [vmem:[#allocation5] sm:$0xff]  ;;  %774 = vmatpush.msk.msra.mxu2 %vm82_vm0, %v68_v2  ;;  %v65_v6 = vld [vmem:[#allocation5 + $0x10] sm:$0xff]  ;;  %v165_v7 = vld [vmem:[#allocation5 + $0x18] sm:$0xff]  ;;  %vm78_vm1 = vcmask 97280   ;;  %s1071_s0 = smov [#allocation8]   ;;  %s759_s5 = sshll.u32 %s1131_s3, 4  ;;  %s760_s5 = int_to_ptr.hbm [resolvable:$true] %s759_s5 }
  0x11   :  { %776 = vmatpush.msk.msra.mxu3 %vm82_vm0, %v168_v3  ;;  %v60_v8 = vld [vmem:[#allocation2] sm:$0x3]  ;;  %107 = vmatpush.msra.mxu0 %v63_v4  ;;  %v259_v9 = vld [vmem:[#allocation5 + $0x98] sm:$0xf]  ;;  %v169_v10 = vld [vmem:[#allocation5 + $0x80] sm:$0xf] }
  0x12   :  { %127 = vmatpush.msra.mxu1 %v64_v5  ;;  %147 = vmatpush.msra.mxu2 %v65_v6  ;;  %v258_v11 = vld [vmem:[#allocation5 + $0x90] sm:$0xf]  ;;  %v170_v12 = vld [vmem:[#allocation5 + $0x88] sm:$0xf]  ;;  %v256_v13 = vld [vmem:[#allocation5 + $0x38] sm:$0xff]  ;;  %s757_s2 = sshll.u32 %s1071_s0, 4  ;;  %s758_s2 = int_to_ptr.vmem [resolvable:$true] %s757_s2 }
  0x13   :  { %204 = vmatpush.msra.mxu3 %v165_v7  ;;  %771 = vmatmul.msk.f32.vlgmr.msra.gmra.mxu0 %vm78_vm1, %v60_v8  ;;  %v166_v14 = vld [vmem:[#allocation5 + $0x20] sm:$0xff]  ;;  %v167_v15 = vld [vmem:[#allocation5 + $0x28] sm:$0xff]  ;;  %v255_v16 = vld [vmem:[#allocation5 + $0x30] sm:$0xff]  ;;  %vm750_vm2 = vcmask 74752  }
  0x14   :  { %773 = vmatmul.msk.f32.vlgmr.msra.gmra.mxu1 %vm78_vm1, %v60_v8  ;;  %775 = vmatmul.msk.f32.vlgmr.msra.gmra.mxu2 %vm78_vm1, %v60_v8  ;;  %v350_v17 = vld [vmem:[#allocation5 + $0xb8] sm:$0xf]  ;;  %v260_v18 = vld [vmem:[#allocation5 + $0xa0] sm:$0xf]  ;;  %v349_v19 = vld [vmem:[#allocation5 + $0xb0] sm:$0xf] }
  0x15   :  { %777 = vmatmul.msk.f32.vlgmr.msra.gmra.mxu3 %vm78_vm1, %v60_v8  ;;  %778 = vmatpush.msk.msrb.mxu0 %vm82_vm0, %v169_v10  ;;  %v348_v20 = vld [vmem:[#allocation5 + $0xa8] sm:$0xf]  ;;  %v347_v21 = vld [vmem:[#allocation5 + $0x58] sm:$0xff]  ;;  %v257_v22 = vld [vmem:[#allocation5 + $0x40] sm:$0xff] }
  0x16   :  { %784 = vmatpush.msk.msrb.mxu3 %vm82_vm0, %v259_v9  ;;  %782 = vmatpush.msk.msrb.mxu2 %vm82_vm0, %v258_v11  ;;  %v345_v23 = vld [vmem:[#allocation5 + $0x48] sm:$0xff]  ;;  %v346_v24 = vld [vmem:[#allocation5 + $0x50] sm:$0xff]  ;;  %v929_v25 = vld [vmem:[#allocation7 + $0x38] sm:$0xff] }
  0x17   :  { %780 = vmatpush.msk.msrb.mxu1 %vm82_vm0, %v170_v12  ;;  %224 = vmatpush.msrb.mxu0 %v166_v14  ;;  %v928_v26 = vld [vmem:[#allocation7 + $0x30] sm:$0xff]  ;;  %v937_v27 = vld [vmem:[#allocation7 + $0x78] sm:$0xff]  ;;  %v927_v29 = vld [vmem:[#allocation7 + $0x28] sm:$0xff] }
  0x18   :  { %314 = vmatpush.msrb.mxu3 %v256_v13  ;;  %294 = vmatpush.msrb.mxu2 %v255_v16  ;;  %v945_v28 = vld [vmem:[#allocation7 + $0xb8] sm:$0xff]  ;;  %v936_v30 = vld [vmem:[#allocation7 + $0x70] sm:$0xff]  ;;  %v926_v32 = vld [vmem:[#allocation7 + $0x20] sm:$0xff] }
  0x19   :  { %244 = vmatpush.msrb.mxu1 %v167_v15  ;;  %786 = vmatpush.msk.msra.mxu0 %vm82_vm0, %v260_v18  ;;  %v944_v31 = vld [vmem:[#allocation7 + $0xb0] sm:$0xff]  ;;  %v935_v33 = vld [vmem:[#allocation7 + $0x68] sm:$0xff]  ;;  %v925_v35 = vld [vmem:[#allocation7 + $0x18] sm:$0xff] }
  0x1a   :  { %792 = vmatpush.msk.msra.mxu3 %vm82_vm0, %v350_v17  ;;  %790 = vmatpush.msk.msra.mxu2 %vm82_vm0, %v349_v19  ;;  %v943_v34 = vld [vmem:[#allocation7 + $0xa8] sm:$0xff]  ;;  %v934_v36 = vld [vmem:[#allocation7 + $0x60] sm:$0xff]  ;;  %v924_v38 = vld [vmem:[#allocation7 + $0x10] sm:$0xff] }
  0x1b   :  { %788 = vmatpush.msk.msra.mxu1 %vm82_vm0, %v348_v20  ;;  %779 = vmatmul.msk.f32.vlgmr.msrb.gmra.mxu0 %vm78_vm1, %v60_v8  ;;  %v942_v37 = vld [vmem:[#allocation7 + $0xa0] sm:$0xff]  ;;  %v933_v39 = vld [vmem:[#allocation7 + $0x58] sm:$0xff]  ;;  %v923_v41 = vld [vmem:[#allocation7 + $0x8] sm:$0xff] }
  0x1c   :  { %781 = vmatmul.msk.f32.vlgmr.msrb.gmra.mxu1 %vm78_vm1, %v60_v8  ;;  %783 = vmatmul.msk.f32.vlgmr.msrb.gmra.mxu2 %vm78_vm1, %v60_v8  ;;  %v941_v40 = vld [vmem:[#allocation7 + $0x98] sm:$0xff]  ;;  %v932_v42 = vld [vmem:[#allocation7 + $0x50] sm:$0xff]  ;;  %v922_v44 = vld [vmem:[#allocation7] sm:$0xff] }
  0x1d   :  { %785 = vmatmul.msk.f32.vlgmr.msrb.gmra.mxu3 %vm78_vm1, %v60_v8  ;;  %334 = vmatpush.msra.mxu0 %v257_v22  ;;  %v940_v43 = vld [vmem:[#allocation7 + $0x90] sm:$0xff]  ;;  %v931_v45 = vld [vmem:[#allocation7 + $0x48] sm:$0xff]  ;;  %v930_v47 = vld [vmem:[#allocation7 + $0x40] sm:$0xff] }
  0x1e   :  { %424 = vmatpush.msra.mxu3 %v347_v21  ;;  %384 = vmatpush.msra.mxu1 %v345_v23  ;;  %v939_v46 = vld [vmem:[#allocation7 + $0x88] sm:$0xff]  ;;  %v938_v48 = vld [vmem:[#allocation7 + $0x80] sm:$0xff]  ;;  %v953_v52 = vld [vmem:[#allocation7 + $0xf8] sm:$0xff] }
  0x1f   :  { %404 = vmatpush.msra.mxu2 %v346_v24  ;;  %631 = vmatpush.bf16.msrb.mxu0 %v929_v25  ;;  %v70_v49 = vld [vmem:[#allocation5 + $0x64] ss:$8 sm:$0x7]  ;;  %v62_v59 = vld [vmem:[#allocation5 + $0x65] ss:$8 sm:$0x7] }
  0x20   :  { %644 = vmatpush.bf16.msrb.mxu1 %v937_v27  ;;  %v72_v53 = vperm.slane %v70_v49, 0  ;;  %737 = vmatpush.bf16.msrb.mxu3 %v953_v52  ;;  %v952_v54 = vld [vmem:[#allocation7 + $0xf0] sm:$0xff]  ;;  %v172_v55 = vld [vmem:[#allocation5 + $0x7c] ss:$8 sm:$0x7]  ;;  %v73_v60 = vperm.slane %v70_v49, 1 }
  0x21   :  { %657 = vmatpush.bf16.msrb.mxu2 %v945_v28  ;;  %v174_v57 = vperm.slane %v172_v55, 0  ;;  %v951_v58 = vld [vmem:[#allocation7 + $0xe8] sm:$0xff]  ;;  %v74_v63 = vperm.slane %v70_v49, 2  ;;  %v262_v2 = vld [vmem:[#allocation5 + $0x94] ss:$8 sm:$0x7] }
  0x22   :  { %v156_v4 = vperm.slane %v62_v59, 0  ;;  %v352_v6 = vld [vmem:[#allocation5 + $0xac] ss:$8 sm:$0x7]  ;;  %v176_v10 = vperm.slane %v172_v55, 2  ;;  %v264_v11 = vperm.slane %v262_v2, 0 }
  0x23   :  { %787 = vmatmul.msk.f32.vlgmr.msra.gmra.mxu0 %vm78_vm1, %v60_v8  ;;  %v354_v12 = vperm.slane %v352_v6, 0  ;;  %v265_v15 = vperm.slane %v262_v2, 1  ;;  %v266_v16 = vperm.slane %v262_v2, 2  ;;  %v157_v18 = vperm.slane %v62_v59, 1 }
  0x24   :  { %789 = vmatmul.msk.f32.vlgmr.msra.gmra.mxu1 %vm78_vm1, %v60_v8  ;;  %791 = vmatmul.msk.f32.vlgmr.msra.gmra.mxu2 %vm78_vm1, %v60_v8  ;;  %v158_v23 = vperm.slane %v62_v59, 2  ;;  %v950_v59 = vld [vmem:[#allocation7 + $0xe0] sm:$0xff] }
  0x25   :  { %793 = vmatmul.msk.f32.vlgmr.msra.gmra.mxu3 %vm78_vm1, %v60_v8  ;;  %632 = vmatpush.bf16.msrb.mxu0 %v928_v26  ;;  %v175_v8 = vperm.slane %v172_v55, 1 }
  0x26   :  { %645 = vmatpush.bf16.msrb.mxu1 %v936_v30  ;;  %658 = vmatpush.bf16.msrb.mxu2 %v944_v31 }
  0x27   :  { %738 = vmatpush.bf16.msrb.mxu3 %v952_v54 }
  0x29   :  { %633 = vmatpush.bf16.msrb.mxu0 %v927_v29 }
  0x2a   :  { %646 = vmatpush.bf16.msrb.mxu1 %v935_v33  ;;  %659 = vmatpush.bf16.msrb.mxu2 %v943_v34 }
  0x2b   :  { %739 = vmatpush.bf16.msrb.mxu3 %v951_v58 }
  0x2d   :  { %634 = vmatpush.bf16.msrb.mxu0 %v926_v32 }
  0x2e   :  { %647 = vmatpush.bf16.msrb.mxu1 %v934_v36  ;;  %660 = vmatpush.bf16.msrb.mxu2 %v942_v37  ;;  %v355_v36 = vperm.slane %v352_v6, 1 }
  0x2f   :  { %740 = vmatpush.bf16.msrb.mxu3 %v950_v59 }
  0x31   :  { %635 = vmatpush.bf16.msrb.mxu0 %v925_v35 }
  0x32   :  { %648 = vmatpush.bf16.msrb.mxu1 %v933_v39  ;;  %661 = vmatpush.bf16.msrb.mxu2 %v941_v40  ;;  %v356_v40 = vperm.slane %v352_v6, 2 }
  0x35   :  { %636 = vmatpush.bf16.msrb.mxu0 %v924_v38 }
  0x36   :  { %649 = vmatpush.bf16.msrb.mxu1 %v932_v42  ;;  %662 = vmatpush.bf16.msrb.mxu2 %v940_v43 }
  0x39   :  { %637 = vmatpush.bf16.msrb.mxu0 %v923_v41 }
  0x3a   :  { %650 = vmatpush.bf16.msrb.mxu1 %v931_v45  ;;  %663 = vmatpush.bf16.msrb.mxu2 %v939_v46 }
  0x3d   :  { %638 = vmatpush.bf16.msrb.mxu0 %v922_v44 }
  0x3e   :  { %651 = vmatpush.bf16.msrb.mxu1 %v930_v47  ;;  %664 = vmatpush.bf16.msrb.mxu2 %v938_v48 }
  0x90   :  { %v109_v50 = vpop.f32.mrf.mxu0 }
  0x91   :  { %v129_v51 = vpop.f32.mrf.mxu1  ;;  %v110_v56 = vadd.f32 %v109_v50, %v72_v53 }
  0x92   :  { %v130_v7 = vadd.f32 %v129_v51, %v73_v60  ;;  %v949_v60 = vld [vmem:[#allocation7 + $0xd8] sm:$0xff] }
  0x93   :  { %v152_v3 = vmax.f32 %v110_v56, 0.0  ;;  %741 = vmatpush.bf16.msrb.mxu3 %v949_v60 }
  0x94   :  { %v153_v17 = vmax.f32 %v130_v7, 0.0 }
  0x95   :  { %v162_v13 = vmax.f32 %v156_v4, %v152_v3 }
  0x96   :  { %v163_v33 = vmax.f32 %v157_v18, %v153_v17 }
  0x97   :  { %v149_v61 = vpop.f32.mrf.mxu2 }
  0x98   :  { %v206_v62 = vpop.f32.mrf.mxu3  ;;  %v226_v0 = vpop.f32.mrf.mxu0  ;;  %v150_v9 = vadd.f32 %v149_v61, %v74_v63  ;;  %v948_v61 = vld [vmem:[#allocation7 + $0xd0] sm:$0xff]  ;;  %v946_v63 = vld [vmem:[#allocation7 + $0xc0] sm:$0xff] }
  0x99   :  { %v246_v1 = vpop.f32.mrf.mxu1  ;;  %v207_v5 = vadd.f32 %v206_v62, %v174_v57  ;;  %v227_v19 = vadd.f32 %v226_v0, %v175_v8  ;;  %742 = vmatpush.bf16.msrb.mxu3 %v948_v61  ;;  %v947_v62 = vld [vmem:[#allocation7 + $0xc8] sm:$0xff] }
  0x9a   :  { %v154_v22 = vmax.f32 %v150_v9, 0.0  ;;  %v247_v24 = vadd.f32 %v246_v1, %v176_v10  ;;  %v486_v1 = vld [vmem:[#allocation5 + $0x66] ss:$0 sm:$0xff] }
  0x9b   :  { %v249_v14 = vmax.f32 %v207_v5, 0.0  ;;  %v250_v34 = vmax.f32 %v227_v19, 0.0 }
  0x9c   :  { %v164_v37 = vmax.f32 %v158_v23, %v154_v22  ;;  %v251_v38 = vmax.f32 %v247_v24, 0.0 }
  0x9d   :  { %v252_v29 = vmax.f32 %v162_v13, %v249_v14  ;;  %v253_v44 = vmax.f32 %v163_v33, %v250_v34  ;;  %743 = vmatpush.bf16.msrb.mxu3 %v947_v62 }
  0x9e   :  { %v254_v47 = vmax.f32 %v164_v37, %v251_v38 }
  0x9f   :  { %v296_v20 = vpop.f32.mrf.mxu2 }
  0xa0   :  { %v316_v21 = vpop.f32.mrf.mxu3  ;;  %v297_v25 = vadd.f32 %v296_v20, %v264_v11  ;;  %v336_v26 = vpop.f32.mrf.mxu0 }
  0xa1   :  { %v386_v27 = vpop.f32.mrf.mxu1  ;;  %v317_v31 = vadd.f32 %v316_v21, %v265_v15  ;;  %v337_v32 = vadd.f32 %v336_v26, %v266_v16  ;;  %744 = vmatpush.bf16.msrb.mxu3 %v946_v63 }
  0xa2   :  { %v387_v28 = vadd.f32 %v386_v27, %v354_v12  ;;  %v339_v30 = vmax.f32 %v297_v25, 0.0  ;;  %v688_v12 = vld [vmem:[#allocation5 + $0x67] ss:$0 sm:$0xff] }
  0xa3   :  { %v340_v41 = vmax.f32 %v317_v31, 0.0  ;;  %v341_v42 = vmax.f32 %v337_v32, 0.0 }
  0xa4   :  { %v429_v35 = vmax.f32 %v387_v28, 0.0  ;;  %v342_v39 = vmax.f32 %v252_v29, %v339_v30 }
  0xa5   :  { %v343_v51 = vmax.f32 %v253_v44, %v340_v41  ;;  %v344_v52 = vmax.f32 %v254_v47, %v341_v42 }
  0xa6   :  { %v432_v43 = vmax.f32 %v342_v39, %v429_v35 }
  0xa7   :  { %v406_v45 = vpop.f32.mrf.mxu2 }
  0xa8   :  { %v426_v46 = vpop.f32.mrf.mxu3  ;;  %v435_v48 = vpack.c.bf16 %v432_v43, %v432_v43  ;;  %v407_v49 = vadd.f32 %v406_v45, %v355_v36 }
  0xa9   :  { %v427_v50 = vadd.f32 %v426_v46, %v356_v40 }
  0xaa   :  { %v430_v53 = vmax.f32 %v407_v49, 0.0  ;;  %639 = vmatmul.bf16.vlgmr.msrb.gmra.mxu0 %v435_v48 }
  0xab   :  { %v431_v54 = vmax.f32 %v427_v50, 0.0 }
  0xac   :  { %v433_v55 = vmax.f32 %v343_v51, %v430_v53 }
  0xad   :  { %v434_v56 = vmax.f32 %v344_v52, %v431_v54 }
  0xae   :  { %v436_v57 = vpack.c.bf16 %v433_v55, %v433_v55 }
  0xaf   :  { %v437_v58 = vpack.c.bf16 %v434_v56, %v434_v56 }
  0xb0   :  { %652 = vmatmul.bf16.vlgmr.msrb.gmra.mxu1 %v436_v57 }
  0xb1   :  { %665 = vmatmul.bf16.vlgmr.msrb.gmra.mxu2 %v437_v58 }
 0x127   :  { %v640_v0 = vpop.f32.mrf.mxu0 }
 0x128   :  { %v641_v4 = vadd.f32 %v640_v0, %v486_v1 }
 0x12d   :  { %v653_v2 = vpop.f32.mrf.mxu1 }
 0x12e   :  { %v654_v5 = vadd.f32 %v653_v2, %v641_v4 }
 0x12f   :  { %v642_v3 = vpop.f32.mrf.mxu0 }
 0x134   :  { %v666_v6 = vpop.f32.mrf.mxu2 }
 0x135   :  { %v667_v7 = vadd.f32 %v666_v6, %v654_v5  ;;  %v655_v8 = vpop.f32.mrf.mxu1 }
 0x137   :  { %v670_v9 = vmax.f32 %v667_v7, 0.0 }
 0x139   :  { %v671_v10 = vpack.c.bf16 %v670_v9, %v670_v9 }
 0x13b   :  { %745 = vmatmul.bf16.vlgmr.msrb.gmra.mxu3 %v671_v10 }
 0x13c   :  { %v668_v11 = vpop.f32.mrf.mxu2 }
 0x1be   :  { %v746_v13 = vpop.f32.mrf.mxu3 }
 0x1bf   :  { %v747_v14 = vadd.f32 %v746_v13, %v688_v12 }
 0x1c1   :  { %751 = vst.msk [vmem:[#allocation8] sm:$0x3] %vm750_vm2, %v747_v14 }
 0x1c2   :  { %762 = dma.vmem_to_hbm [thread:$0]  %s758_s2, 32, %s760_s5, [#allocation4]  }
 0x1c6   :  { %v748_v15 = vpop.f32.mrf.mxu3 }
 0x1c7   :  { %1062 = dma.done.wait [#allocation4], 32  }
 0x1c8   :  { %1063 = vsyncadd [#allocation4], 4294967264 }
 0x1c9   :  { %767 = vsyncpa [#allocation3], 1 }
 0x1ca   :  { %768 = vsyncpa [#allocation6], 1 }
 0x1cb   :  { %769 = vsyncpa [#allocation4], 1 }

</bundles_post_ra>
